<compile_context>
chip_gen: v6e
topology: v6e:2x2x1
jax: 0.10.0
libtpu: 0.0.40
codegen_flags: <defaults>
</compile_context>

<pallas_src>
import functools

import jax
import jax.numpy as jnp
from jax.experimental import pallas as pl
from jax.experimental.pallas import tpu as pltpu


def _round_up(n, m):
    return ((n + m - 1) // m) * m


def _pick_k_tile(total, want):
    """Largest multiple of 128 that divides `total` and is <= want."""
    want = max(128, min(want, total))
    want -= want % 128
    for kt in range(want, 127, -128):
        if total % kt == 0:
            return kt
    return 128


# ------------------------------ kernels ---------------------------------

def _lstm_heads_epilogue(gates, cx, wh_ref, bh_ref,
                         heads_ref, hx_out_ref, cx_out_ref, dp):
    """Shared LSTM nonlinearity + fused-head epilogue (all f32 elementwise)."""
    # dp is a multiple of 128 -> each gate slice is a whole-vreg, lane-aligned view.
    i_g = jax.nn.sigmoid(gates[:, 0 * dp:1 * dp])
    f_g = jax.nn.sigmoid(gates[:, 1 * dp:2 * dp])
    g_g = jnp.tanh(gates[:, 2 * dp:3 * dp])
    o_g = jax.nn.sigmoid(gates[:, 3 * dp:4 * dp])

    c_new = f_g * cx + i_g * g_g
    h_new = o_g * jnp.tanh(c_new)

    # Fused lane-dense head matmul: [critic | mu | sigma] padded to 128 lanes
    # -> one MXU drain, one unmasked store.
    heads_ref[...] = (jnp.dot(h_new.astype(wh_ref.dtype), wh_ref[...],
                              preferred_element_type=jnp.float32)
                      + bh_ref[...])
    hx_out_ref[...] = h_new
    cx_out_ref[...] = c_new


def _r_module_single_kernel(xh_ref, cx_ref, b_ref, wg_ref, wh_ref, bh_ref,
                            heads_ref, hx_out_ref, cx_out_ref, *, dp):
    # Everything resident: one fused gate matmul, no scratch accumulator.
    gates = (jnp.dot(xh_ref[...], wg_ref[...],
                     preferred_element_type=jnp.float32)
             + b_ref[...])
    _lstm_heads_epilogue(gates, cx_ref[...], wh_ref, bh_ref,
                         heads_ref, hx_out_ref, cx_out_ref, dp)


def _r_module_stream_kernel(xh_ref, cx_ref, b_ref, wg_ref, wh_ref, bh_ref,
                            heads_ref, hx_out_ref, cx_out_ref,
                            acc_ref, *, dp):
    k = pl.program_id(0)

    @pl.when(k == 0)
    def _init():
        # Fold the (combined) LSTM bias into the accumulator init.
        acc_ref[...] = jnp.broadcast_to(b_ref[...], acc_ref.shape)

    # Fused gate matmul: [x | h] @ [W_ih ; W_hh], streamed over K tiles
    # (bf16 inputs, f32 accumulation on the MXU).
    acc_ref[...] += jnp.dot(xh_ref[...], wg_ref[...],
                            preferred_element_type=jnp.float32)

    @pl.when(k == pl.num_programs(0) - 1)
    def _finish():
        _lstm_heads_epilogue(acc_ref[...], cx_ref[...], wh_ref, bh_ref,
                             heads_ref, hx_out_ref, cx_out_ref, dp)


# ------------------------------ wrapper ----------------------------------

def r_module_forward(x, hx, cx, params, *, k_tile=None):
    """R_Module forward pass (non-baseline, continuous actions).

    k_tile=None -> auto: single-shot kernel when the fused gate weight fits
    comfortably in VMEM, otherwise stream the stacked contraction axis.
    Passing an explicit k_tile forces the streaming (K-grid) kernel.
    """
    B, dim = x.shape
    action_space = params["wa"].shape[1]

    dp = _round_up(dim, 128)                       # lane-aligned hidden width
    hp = _round_up(1 + 2 * action_space, 128)      # lane-dense fused head width

    def pad_cols(a, new_cols):
        return jnp.pad(a, ((0, 0), (0, new_cols - a.shape[1])))

    def pad_rows(a, new_rows):
        return jnp.pad(a, ((0, new_rows - a.shape[0]), (0, 0)))

    def pad_gates(w):
        # (rows, 4*dim) laid out [i|f|g|o] -> pad each gate block to dp columns.
        rows = w.shape[0]
        w = w.reshape(rows, 4, dim)
        w = jnp.pad(w, ((0, 0), (0, 0), (0, dp - dim)))
        return w.reshape(rows, 4 * dp)

    # ---- activations (zero padding keeps the padded lanes exactly 0 through
    #      the recurrence: sigmoid(0)*0 + sigmoid(0)*tanh(0) = 0) ----
    x_p = pad_cols(x, dp)
    h_p = pad_cols(hx, dp)
    c_p = pad_cols(cx, dp).astype(jnp.float32)
    xh = jnp.concatenate([x_p, h_p], axis=1).astype(jnp.bfloat16)      # (B, 2*dp)

    # ---- fused gate weight / bias ----
    wih_p = pad_rows(pad_gates(params["wih"]), dp)                     # (dp, 4*dp)
    whh_p = pad_rows(pad_gates(params["whh"]), dp)                     # (dp, 4*dp)
    wg = jnp.concatenate([wih_p, whh_p], axis=0).astype(jnp.bfloat16)  # (2*dp, 4*dp)
    bg = pad_gates(params["b"]).astype(jnp.float32)                    # (1, 4*dp)

    # ---- fused head weight / bias: [critic | mu | sigma] ----
    wh_cat = jnp.concatenate([params["wc"], params["wa"], params["ws"]], axis=1)
    wh = pad_cols(pad_rows(wh_cat, dp), hp).astype(jnp.bfloat16)       # (dp, hp)
    bh = pad_cols(
        jnp.concatenate([params["bc"], params["ba"], params["bs"]], axis=1),
        hp).astype(jnp.float32)                                        # (1, hp)

    out_shape = (
        jax.ShapeDtypeStruct((B, hp), jnp.float32),   # fused heads
        jax.ShapeDtypeStruct((B, dp), jnp.float32),   # hx'
        jax.ShapeDtypeStruct((B, dp), jnp.float32),   # cx'
    )
    compiler_params = pltpu.CompilerParams(
        dimension_semantics=("arbitrary",),   # single axis; K axis is a reduction
        vmem_limit_bytes=48 * 1024 * 1024,
    )

    # Path selection: single-shot when the fused gate weight is small enough to
    # sit whole in VMEM with room to spare (true for typical RL policy dims).
    wg_bytes = 2 * dp * 4 * dp * 2  # bf16
    single_shot = (k_tile is None) and (wg_bytes <= 16 * 1024 * 1024)

    if single_shot:
        grid_spec = pltpu.PrefetchScalarGridSpec(
            num_scalar_prefetch=0,
            grid=(1,),
            in_specs=[
                pl.BlockSpec((B, 2 * dp), lambda k: (0, 0)),      # [x | h]
                pl.BlockSpec((B, dp), lambda k: (0, 0)),          # cx
                pl.BlockSpec((1, 4 * dp), lambda k: (0, 0)),      # gate bias
                pl.BlockSpec((2 * dp, 4 * dp), lambda k: (0, 0)),  # fused gate W
                pl.BlockSpec((dp, hp), lambda k: (0, 0)),         # fused head W
                pl.BlockSpec((1, hp), lambda k: (0, 0)),          # fused head b
            ],
            out_specs=[
                pl.BlockSpec((B, hp), lambda k: (0, 0)),
                pl.BlockSpec((B, dp), lambda k: (0, 0)),
                pl.BlockSpec((B, dp), lambda k: (0, 0)),
            ],
        )
        kernel = functools.partial(_r_module_single_kernel, dp=dp)
    else:
        kt = _pick_k_tile(2 * dp, 512 if k_tile is None else k_tile)
        grid_spec = pltpu.PrefetchScalarGridSpec(
            num_scalar_prefetch=0,
            grid=((2 * dp) // kt,),
            in_specs=[
                pl.BlockSpec((B, kt), lambda k: (0, k)),          # xh: K tiles
                pl.BlockSpec((B, dp), lambda k: (0, 0)),          # cx: resident
                pl.BlockSpec((1, 4 * dp), lambda k: (0, 0)),      # gate bias
                pl.BlockSpec((kt, 4 * dp), lambda k: (k, 0)),     # gate W: K tiles
                pl.BlockSpec((dp, hp), lambda k: (0, 0)),         # fused head W
                pl.BlockSpec((1, hp), lambda k: (0, 0)),          # fused head b
            ],
            out_specs=[
                pl.BlockSpec((B, hp), lambda k: (0, 0)),
                pl.BlockSpec((B, dp), lambda k: (0, 0)),
                pl.BlockSpec((B, dp), lambda k: (0, 0)),
            ],
            scratch_shapes=[pltpu.VMEM((B, 4 * dp), jnp.float32)],
        )
        kernel = functools.partial(_r_module_stream_kernel, dp=dp)

    heads, hx_n, cx_n = pl.pallas_call(
        kernel,
        out_shape=out_shape,
        grid_spec=grid_spec,
        compiler_params=compiler_params,
    )(xh, c_p, bg, wg, wh, bh)

    critic = heads[:, :1]
    mu = heads[:, 1:1 + action_space]
    sigma = heads[:, 1 + action_space:1 + 2 * action_space]
    return critic, (mu, sigma), (hx_n[:, :dim], cx_n[:, :dim])


# --------------------------- parameter init -----------------------------

def normalized_columns_init(key, out_features, in_features, std):
    # matches normalized_columns_initializer: row-wise (dim=1) normalization
    w = jax.random.normal(key, (out_features, in_features), dtype=jnp.float32)
    w = w * std / jnp.sqrt(jnp.sum(w * w, axis=1, keepdims=True))
    return w


def make_params(key, dim, action_space):
    k = jax.random.split(key, 6)
    # LSTMCell default PyTorch init: U(-1/sqrt(dim), 1/sqrt(dim)), biases zeroed
    bound = 1.0 / jnp.sqrt(jnp.float32(dim))
    w_ih = jax.random.uniform(k[0], (4 * dim, dim), jnp.float32, -bound, bound)
    w_hh = jax.random.uniform(k[1], (4 * dim, dim), jnp.float32, -bound, bound)
    b = jnp.zeros((1, 4 * dim), jnp.float32)  # bias_ih + bias_hh, both zeroed

    w_actor = normalized_columns_init(k[2], action_space, dim, 0.01)
    w_sigma = normalized_columns_init(k[3], action_space, dim, 0.01)
    w_critic = normalized_columns_init(k[4], 1, dim, 1.0)

    # stored transposed (in, out) for the kernel's row-major matmuls
    return {
        "wih": w_ih.T, "whh": w_hh.T, "b": b,
        "wa": w_actor.T, "ba": jnp.zeros((1, action_space), jnp.float32),
        "ws": w_sigma.T, "bs": jnp.zeros((1, action_space), jnp.float32),
        "wc": w_critic.T, "bc": jnp.zeros((1, 1), jnp.float32),
    }


# ------------------------------- reference ------------------------------

def r_module_ref(x, hx, cx, params):
    """Pure-JAX reference with the same bf16-weight / f32-accumulate matmuls."""
    def mm(a, w):
        return jnp.dot(a.astype(jnp.bfloat16), w.astype(jnp.bfloat16),
                       preferred_element_type=jnp.float32)
    dim = hx.shape[-1]
    gates = mm(x, params["wih"]) + mm(hx, params["whh"]) + params["b"]
    i = jax.nn.sigmoid(gates[:, :dim])
    f = jax.nn.sigmoid(gates[:, dim:2 * dim])
    g = jnp.tanh(gates[:, 2 * dim:3 * dim])
    o = jax.nn.sigmoid(gates[:, 3 * dim:])
    c_new = f * cx + i * g
    h_new = o * jnp.tanh(c_new)
    critic = mm(h_new, params["wc"]) + params["bc"]
    mu = mm(h_new, params["wa"]) + params["ba"]
    sigma = mm(h_new, params["ws"]) + params["bs"]
    return critic, (mu, sigma), (h_new, c_new)


if __name__ == "__main__":
    B, dim, action_space = 2, 32, 4

    key = jax.random.PRNGKey(0)
    kx, kh, kc, kp = jax.random.split(key, 4)
    x = jax.random.normal(kx, (B, dim), jnp.float32)
    hx = jax.random.normal(kh, (B, dim), jnp.float32)
    cx = jax.random.normal(kc, (B, dim), jnp.float32)
    params = make_params(kp, dim, action_space)

    rc, (rmu, rsig), (rh, rcx) = r_module_ref(x, hx, cx, params)

    def check(outs):
        critic, (mu, sigma), (hx_n, cx_n) = outs
        jax.block_until_ready((critic, mu, sigma, hx_n, cx_n))
        for got, ref in ((critic, rc), (mu, rmu), (sigma, rsig),
                         (hx_n, rh), (cx_n, rcx)):
            assert got.shape == ref.shape, "shape mismatch vs reference"
            assert jnp.allclose(got, ref, atol=1e-3, rtol=1e-3), \
                "mismatch vs reference"

    # 1) default path: single-shot fused kernel (no scratch accumulator)
    check(r_module_forward(x, hx, cx, params))

    # 2) streaming path: k_tile=128 -> 2-step reduction grid over [x|h], so the
    #    accumulate / init / finalize paths are all exercised too.
    check(r_module_forward(x, hx, cx, params, k_tile=128))

    # TODO(synk): baseline=True path (two ELU Linear layers before the LSTM) and
    # the discrete-action branch are not exercised; default R_Module ctor is
    # baseline=False, discrete=False. rhat_linear is unused in forward().
    print("KERNEL_OK")
</pallas_src>

<mosaic_0001>
module attributes {stable_mosaic.version = 11 : i64} {
  func.func @_r_module_single_kernel(%arg0: i32, %arg1: memref<2x256xbf16, #tpu.memory_space<vmem>>, %arg2: memref<2x128xf32, #tpu.memory_space<vmem>>, %arg3: memref<1x512xf32, #tpu.memory_space<vmem>>, %arg4: memref<256x512xbf16, #tpu.memory_space<vmem>>, %arg5: memref<128x128xbf16, #tpu.memory_space<vmem>>, %arg6: memref<1x128xf32, #tpu.memory_space<vmem>>, %arg7: memref<2x128xf32, #tpu.memory_space<vmem>>, %arg8: memref<2x128xf32, #tpu.memory_space<vmem>>, %arg9: memref<2x128xf32, #tpu.memory_space<vmem>>) attributes {dimension_semantics = [#tpu.dimension_semantics<arbitrary>], iteration_bounds = array<i64: 1>, scalar_prefetch = 0 : i64, scratch_operands = 0 : i64, tpu.core_type = #tpu.core_type<tc>, window_params = [{pipeline_mode = #tpu.pipeline_mode<synchronous>, transform_indices = @transform_0, window_bounds = array<i64: 2, 256>}, {pipeline_mode = #tpu.pipeline_mode<synchronous>, transform_indices = @transform_1, window_bounds = array<i64: 2, 128>}, {pipeline_mode = #tpu.pipeline_mode<synchronous>, transform_indices = @transform_2, window_bounds = array<i64: 1, 512>}, {pipeline_mode = #tpu.pipeline_mode<synchronous>, transform_indices = @transform_3, window_bounds = array<i64: 256, 512>}, {pipeline_mode = #tpu.pipeline_mode<synchronous>, transform_indices = @transform_4, window_bounds = array<i64: 128, 128>}, {pipeline_mode = #tpu.pipeline_mode<synchronous>, transform_indices = @transform_5, window_bounds = array<i64: 1, 128>}, {pipeline_mode = #tpu.pipeline_mode<synchronous>, transform_indices = @transform_6, window_bounds = array<i64: 2, 128>}, {pipeline_mode = #tpu.pipeline_mode<synchronous>, transform_indices = @transform_7, window_bounds = array<i64: 2, 128>}, {pipeline_mode = #tpu.pipeline_mode<synchronous>, transform_indices = @transform_8, window_bounds = array<i64: 2, 128>}]} {
    %c0 = arith.constant 0 : index
    %c0_0 = arith.constant 0 : index
    %0 = vector.load %arg1[%c0, %c0_0] : memref<2x256xbf16, #tpu.memory_space<vmem>>, vector<2x256xbf16>
    %c0_1 = arith.constant 0 : index
    %c0_2 = arith.constant 0 : index
    %1 = vector.load %arg4[%c0_1, %c0_2] : memref<256x512xbf16, #tpu.memory_space<vmem>>, vector<256x512xbf16>
    %cst = arith.constant dense<0.000000e+00> : vector<2x512xf32>
    %2 = tpu.matmul %0, %1, %cst {dimension_numbers = #tpu.dot_dimension_numbers<[1], [0], [0], [1], [0, 0, 1, 1], [], []>} : vector<2x256xbf16>, vector<256x512xbf16>, vector<2x512xf32> -> vector<2x512xf32>
    %c0_3 = arith.constant 0 : index
    %c0_4 = arith.constant 0 : index
    %3 = vector.load %arg3[%c0_3, %c0_4] : memref<1x512xf32, #tpu.memory_space<vmem>>, vector<1x512xf32>
    %4 = vector.broadcast %3 : vector<1x512xf32> to vector<2x512xf32>
    %5 = arith.addf %2, %4 : vector<2x512xf32>
    %c0_5 = arith.constant 0 : index
    %c0_6 = arith.constant 0 : index
    %6 = vector.load %arg2[%c0_5, %c0_6] : memref<2x128xf32, #tpu.memory_space<vmem>>, vector<2x128xf32>
    %7 = vector.extract_strided_slice %5 {offsets = [0, 0], sizes = [2, 128], strides = [1, 1]} : vector<2x512xf32> to vector<2x128xf32>
    %8 = arith.negf %7 : vector<2x128xf32>
    %9 = math.exp %8 : vector<2x128xf32>
    %cst_7 = arith.constant 1.000000e+00 : f32
    %10 = vector.broadcast %cst_7 : f32 to vector<2x128xf32>
    %11 = arith.addf %10, %9 : vector<2x128xf32>
    %12 = arith.divf %10, %11 : vector<2x128xf32>
    %13 = vector.extract_strided_slice %5 {offsets = [0, 128], sizes = [2, 128], strides = [1, 1]} : vector<2x512xf32> to vector<2x128xf32>
    %14 = arith.negf %13 : vector<2x128xf32>
    %15 = math.exp %14 : vector<2x128xf32>
    %cst_8 = arith.constant 1.000000e+00 : f32
    %16 = vector.broadcast %cst_8 : f32 to vector<2x128xf32>
    %17 = arith.addf %16, %15 : vector<2x128xf32>
    %18 = arith.divf %16, %17 : vector<2x128xf32>
    %19 = vector.extract_strided_slice %5 {offsets = [0, 256], sizes = [2, 128], strides = [1, 1]} : vector<2x512xf32> to vector<2x128xf32>
    %20 = math.tanh %19 : vector<2x128xf32>
    %21 = vector.extract_strided_slice %5 {offsets = [0, 384], sizes = [2, 128], strides = [1, 1]} : vector<2x512xf32> to vector<2x128xf32>
    %22 = arith.negf %21 : vector<2x128xf32>
    %23 = math.exp %22 : vector<2x128xf32>
    %cst_9 = arith.constant 1.000000e+00 : f32
    %24 = vector.broadcast %cst_9 : f32 to vector<2x128xf32>
    %25 = arith.addf %24, %23 : vector<2x128xf32>
    %26 = arith.divf %24, %25 : vector<2x128xf32>
    %27 = arith.mulf %18, %6 : vector<2x128xf32>
    %28 = arith.mulf %12, %20 : vector<2x128xf32>
    %29 = arith.addf %27, %28 : vector<2x128xf32>
    %30 = math.tanh %29 : vector<2x128xf32>
    %31 = arith.mulf %26, %30 : vector<2x128xf32>
    %32 = arith.truncf %31 : vector<2x128xf32> to vector<2x128xbf16>
    %c0_10 = arith.constant 0 : index
    %c0_11 = arith.constant 0 : index
    %33 = vector.load %arg5[%c0_10, %c0_11] : memref<128x128xbf16, #tpu.memory_space<vmem>>, vector<128x128xbf16>
    %cst_12 = arith.constant dense<0.000000e+00> : vector<2x128xf32>
    %34 = tpu.matmul %32, %33, %cst_12 {dimension_numbers = #tpu.dot_dimension_numbers<[1], [0], [0], [1], [0, 0, 1, 1], [], []>} : vector<2x128xbf16>, vector<128x128xbf16>, vector<2x128xf32> -> vector<2x128xf32>
    %c0_13 = arith.constant 0 : index
    %c0_14 = arith.constant 0 : index
    %35 = vector.load %arg6[%c0_13, %c0_14] : memref<1x128xf32, #tpu.memory_space<vmem>>, vector<1x128xf32>
    %36 = vector.broadcast %35 : vector<1x128xf32> to vector<2x128xf32>
    %37 = arith.addf %34, %36 : vector<2x128xf32>
    %c0_15 = arith.constant 0 : index
    %c0_16 = arith.constant 0 : index
    %38 = vector.load %arg7[%c0_15, %c0_16] : memref<2x128xf32, #tpu.memory_space<vmem>>, vector<2x128xf32>
    tpu.vector_store %arg7[%c0_15, %c0_16], %37 {strides = array<i32>} : memref<2x128xf32, #tpu.memory_space<vmem>>, vector<2x128xf32>,
    %c0_17 = arith.constant 0 : index
    %c0_18 = arith.constant 0 : index
    %39 = vector.load %arg8[%c0_17, %c0_18] : memref<2x128xf32, #tpu.memory_space<vmem>>, vector<2x128xf32>
    tpu.vector_store %arg8[%c0_17, %c0_18], %31 {strides = array<i32>} : memref<2x128xf32, #tpu.memory_space<vmem>>, vector<2x128xf32>,
    %c0_19 = arith.constant 0 : index
    %c0_20 = arith.constant 0 : index
    %40 = vector.load %arg9[%c0_19, %c0_20] : memref<2x128xf32, #tpu.memory_space<vmem>>, vector<2x128xf32>
    tpu.vector_store %arg9[%c0_19, %c0_20], %29 {strides = array<i32>} : memref<2x128xf32, #tpu.memory_space<vmem>>, vector<2x128xf32>,
    return
  }
  func.func @transform_0(%arg0: i32) -> (i32, i32) {
    %c0_i32 = arith.constant 0 : i32
    %c0_i32_0 = arith.constant 0 : i32
    %c0_i32_1 = arith.constant 0 : i32
    return %c0_i32, %c0_i32_0 : i32, i32
  }
  func.func @transform_1(%arg0: i32) -> (i32, i32) {
    %c0_i32 = arith.constant 0 : i32
    %c0_i32_0 = arith.constant 0 : i32
    %c0_i32_1 = arith.constant 0 : i32
    return %c0_i32, %c0_i32_0 : i32, i32
  }
  func.func @transform_2(%arg0: i32) -> (i32, i32) {
    %c0_i32 = arith.constant 0 : i32
    %c0_i32_0 = arith.constant 0 : i32
    %c0_i32_1 = arith.constant 0 : i32
    return %c0_i32, %c0_i32_0 : i32, i32
  }
  func.func @transform_3(%arg0: i32) -> (i32, i32) {
    %c0_i32 = arith.constant 0 : i32
    %c0_i32_0 = arith.constant 0 : i32
    %c0_i32_1 = arith.constant 0 : i32
    return %c0_i32, %c0_i32_0 : i32, i32
  }
  func.func @transform_4(%arg0: i32) -> (i32, i32) {
    %c0_i32 = arith.constant 0 : i32
    %c0_i32_0 = arith.constant 0 : i32
    %c0_i32_1 = arith.constant 0 : i32
    return %c0_i32, %c0_i32_0 : i32, i32
  }
  func.func @transform_5(%arg0: i32) -> (i32, i32) {
    %c0_i32 = arith.constant 0 : i32
    %c0_i32_0 = arith.constant 0 : i32
    %c0_i32_1 = arith.constant 0 : i32
    return %c0_i32, %c0_i32_0 : i32, i32
  }
  func.func @transform_6(%arg0: i32) -> (i32, i32) {
    %c0_i32 = arith.constant 0 : i32
    %c0_i32_0 = arith.constant 0 : i32
    %c0_i32_1 = arith.constant 0 : i32
    return %c0_i32, %c0_i32_0 : i32, i32
  }
  func.func @transform_7(%arg0: i32) -> (i32, i32) {
    %c0_i32 = arith.constant 0 : i32
    %c0_i32_0 = arith.constant 0 : i32
    %c0_i32_1 = arith.constant 0 : i32
    return %c0_i32, %c0_i32_0 : i32, i32
  }
  func.func @transform_8(%arg0: i32) -> (i32, i32) {
    %c0_i32 = arith.constant 0 : i32
    %c0_i32_0 = arith.constant 0 : i32
    %c0_i32_1 = arith.constant 0 : i32
    return %c0_i32, %c0_i32_0 : i32, i32
  }
}

</mosaic_0001>

<bundles_post_ra>
// kernel: tpu_custom_call.1
= control target key start
LH: loop header
LB: loop body
LE: loop exit
PB: predicated region body
PF: predicated region fallthrough
CT: control target
= control target key end

     0   :  { %14 = vsyncpa [#allocation3], 0  ;;  %s1294_s0 = inlined_call_operand.hbm [shape: bf16[2,256], index: 0, kind: input, shape index: {}]   ;;  %s1295_s1 = inlined_call_operand.hbm [shape: f32[2,128], index: 1, kind: input, shape index: {}]   ;;  %s1296_s2 = inlined_call_operand.hbm [shape: f32[1,512], index: 2, kind: input, shape index: {}]   ;;  %s1297_s3 = inlined_call_operand.hbm [shape: bf16[256,512], index: 3, kind: input, shape index: {}]   ;;  %s1298_s4 = inlined_call_operand.hbm [shape: bf16[128,128], index: 4, kind: input, shape index: {}]   ;;  %s1299_s5 = inlined_call_operand.vmem [shape: f32[1,128], index: 5, kind: input, shape index: {}]   ;;  %s1300_s6 = inlined_call_operand.hbm [shape: f32[2,128], index: 6, kind: output, shape index: {0}]   ;;  %s1301_s7 = inlined_call_operand.hbm [shape: f32[2,128], index: 7, kind: output, shape index: {1}]   ;;  %s1302_s8 = inlined_call_operand.hbm [shape: f32[2,128], index: 8, kind: output, shape index: {2}]  }
   0x1   :  { %15 = vsyncpa [#allocation6], 0 }
   0x2   :  { %16 = vsyncpa [#allocation9], 0 }
   0x3   :  { %17 = vsyncpa [#allocation4], 0 }
   0x4   :  { %18 = vsyncpa [#allocation13], 0  ;;  %s1200_s27 = smov [#allocation5]   ;;  %s1201_s29 = smov [#allocation8]  }
   0x5   :  { %s35_s28 = sshll.u32 %s1200_s27, 4  ;;  %s54_s30 = sshll.u32 %s1201_s29, 4  ;;  %s36_s28 = int_to_ptr.vmem [resolvable:$true] %s35_s28  ;;  %s55_s30 = int_to_ptr.vmem [resolvable:$true] %s54_s30 }
   0x6   :  { %s1038_s9 = scalar_lea.vmem %s36_s28, 32  ;;  %p1043_p1 = scmp.lt.s32.totalorder %s36_s28, %s36_s28 }
   0x7   :  { %p1039_p0 = scmp.ne.s32.totalorder %s36_s28, %s1038_s9  ;;  %p1044_p2 = scmp.lt.s32.totalorder %s1038_s9, %s1038_s9 }
   0x9   :  { %p1045_p3 = por %p1044_p2, %p1043_p1 }
   0xb   :  { %p1046_p4 = pnand %p1045_p3, %p1039_p0 }
   0xd   :  { %1049 = shalt.err (!%p1046_p4)
}
   0xe   :  { %38 = dma.hbm_to_vmem [thread:$0]  %s1295_s1, 32, %s36_s28, [#allocation6]  }
   0xf   :  { %s1058_s12 = scalar_lea.vmem %s55_s30, 8192  ;;  %p1063_p6 = scmp.lt.s32.totalorder %s55_s30, %s55_s30 }
  0x10   :  { %p1059_p5 = scmp.ne.s32.totalorder %s55_s30, %s1058_s12  ;;  %p1064_p7 = scmp.lt.s32.totalorder %s1058_s12, %s1058_s12 }
  0x12   :  { %p1065_p8 = por %p1064_p7, %p1063_p6 }
  0x14   :  { %p1066_p9 = pnand %p1065_p8, %p1059_p5 }
  0x16   :  { %1069 = shalt.err (!%p1066_p9)
}
  0x17   :  { %s1202_s13 = smov 256   ;;  %s1203_s14 = smov 16  }
  0x18   :  { %60 = dma.hbm_to_vmem [thread:$0]  %s1297_s3, 8192, %s55_s30, [#allocation9], %s1202_s13, %s1202_s13, %s1203_s14  }
  0x19   :  { %s1204_s17 = smov [#allocation2]   ;;  %s1205_s19 = smov [#allocation7]  }
  0x1a   :  { %s25_s18 = sshll.u32 %s1204_s17, 4  ;;  %s45_s20 = sshll.u32 %s1205_s19, 4  ;;  %s26_s18 = int_to_ptr.vmem [resolvable:$true] %s25_s18  ;;  %s46_s20 = int_to_ptr.vmem [resolvable:$true] %s45_s20 }
  0x1b   :  { %s1078_s1 = scalar_lea.vmem %s26_s18, 32  ;;  %p1083_p11 = scmp.lt.s32.totalorder %s26_s18, %s26_s18 }
  0x1c   :  { %p1079_p10 = scmp.ne.s32.totalorder %s26_s18, %s1078_s1  ;;  %p1084_p12 = scmp.lt.s32.totalorder %s1078_s1, %s1078_s1 }
  0x1e   :  { %p1085_p13 = por %p1084_p12, %p1083_p11 }
  0x20   :  { %p1086_p0 = pnand %p1085_p13, %p1079_p10 }
  0x22   :  { %1089 = shalt.err (!%p1086_p0)
}
  0x23   :  { %28 = dma.hbm_to_vmem [thread:$0]  %s1294_s0, 32, %s26_s18, [#allocation3]  }
  0x24   :  { %s1098_s23 = scalar_lea.vmem %s46_s20, 64  ;;  %p1103_p2 = scmp.lt.s32.totalorder %s46_s20, %s46_s20 }
  0x25   :  { %p1099_p1 = scmp.ne.s32.totalorder %s46_s20, %s1098_s23  ;;  %p1104_p3 = scmp.lt.s32.totalorder %s1098_s23, %s1098_s23 }
  0x27   :  { %p1105_p4 = por %p1104_p3, %p1103_p2 }
  0x29   :  { %p1106_p5 = pnand %p1105_p4, %p1099_p1 }
  0x2b   :  { %1109 = shalt.err (!%p1106_p5)
}
  0x2c   :  { %48 = dma.hbm_to_vmem [thread:$0]  %s1296_s2, 64, %s46_s20, [#allocation6]  }
  0x2d   :  { %s1206_s25 = smov [#allocation10]  }
  0x2e   :  { %s66_s26 = sshll.u32 %s1206_s25, 4  ;;  %s67_s26 = int_to_ptr.vmem [resolvable:$true] %s66_s26 }
  0x2f   :  { %s1118_s27 = scalar_lea.vmem %s67_s26, 1024  ;;  %p1123_p7 = scmp.lt.s32.totalorder %s67_s26, %s67_s26 }
  0x30   :  { %p1119_p6 = scmp.ne.s32.totalorder %s67_s26, %s1118_s27  ;;  %p1124_p8 = scmp.lt.s32.totalorder %s1118_s27, %s1118_s27 }
  0x32   :  { %p1125_p9 = por %p1124_p8, %p1123_p7 }
  0x34   :  { %p1126_p10 = pnand %p1125_p9, %p1119_p6 }
  0x36   :  { %1129 = shalt.err (!%p1126_p10)
}
  0x37   :  { %s1207_s0 = smov 64   ;;  %s1208_s28 = smov 4  }
  0x38   :  { %72 = dma.hbm_to_vmem [thread:$0]  %s1298_s4, 1024, %s67_s26, [#allocation9], %s1207_s0, %s1207_s0, %s1208_s28  }
  0x39   :  { %1190 = dma.done.wait [#allocation3], 32  }
  0x3a   :  { %1191 = vsyncadd [#allocation3], 4294967264 }
  0x3b   :  { %1192 = dma.done.wait [#allocation6], 96  }
  0x3c   :  { %1193 = vsyncadd [#allocation6], 4294967200 }
  0x3d   :  { %1194 = dma.done.wait [#allocation9], 9216  }
  0x3e   :  { %1195 = vsyncadd [#allocation9], 4294958080  ;;  %v910_v0 = vld [vmem:[#allocation8 + $0xe4] ss:$16 sps:$4 sm:$0xff]   ;;  %v912_v1 = vld [vmem:[#allocation8 + $0xe0] ss:$16 sps:$4 sm:$0xff]   ;;  %v158_v32 = vlaneseq }
  0x3f   :  { %523 = vmatprep.subr.bf16.mxu0 %v910_v0  ;;  %v913_v2 = vld [vmem:[#allocation8 + $0xc4] ss:$16 sps:$4 sm:$0xff]   ;;  %v915_v3 = vld [vmem:[#allocation8 + $0xc0] ss:$16 sps:$4 sm:$0xff]   ;;  %v921_v5 = vld [vmem:[#allocation8 + $0xec] ss:$16 sps:$4 sm:$0xff]  }
  0x40   :  { %524 = vmatpush1.bf16.msra.mxu0 %v912_v1  ;;  %v916_v4 = vld [vmem:[#allocation8 + $0xa4] ss:$16 sps:$4 sm:$0xff]   ;;  %v924_v6 = vld [vmem:[#allocation8 + $0xe8] ss:$16 sps:$4 sm:$0xff]   ;;  %v918_v7 = vld [vmem:[#allocation8 + $0xa0] ss:$16 sps:$4 sm:$0xff]   ;;  %564 = vmatprep.subr.bf16.mxu1 %v921_v5 }
  0x41   :  { %525 = vmatprep.subr.bf16.mxu0 %v913_v2  ;;  %v919_v8 = vld [vmem:[#allocation8 + $0x84] ss:$16 sps:$4 sm:$0xff]   ;;  %565 = vmatpush1.bf16.msra.mxu1 %v924_v6  ;;  %v927_v9 = vld [vmem:[#allocation8 + $0xcc] ss:$16 sps:$4 sm:$0xff]   ;;  %v930_v10 = vld [vmem:[#allocation8 + $0xc8] ss:$16 sps:$4 sm:$0xff]  }
  0x42   :  { %566 = vmatprep.subr.bf16.mxu1 %v927_v9  ;;  %v923_v11 = vld [vmem:[#allocation8 + $0x80] ss:$16 sps:$4 sm:$0xff]   ;;  %v925_v12 = vld [vmem:[#allocation8 + $0x64] ss:$16 sps:$4 sm:$0xff]   ;;  %v933_v13 = vld [vmem:[#allocation8 + $0xac] ss:$16 sps:$4 sm:$0xff]  }
  0x43   :  { %v936_v14 = vld [vmem:[#allocation8 + $0xa8] ss:$16 sps:$4 sm:$0xff]   ;;  %v939_v15 = vld [vmem:[#allocation8 + $0x8c] ss:$16 sps:$4 sm:$0xff]   ;;  %v929_v16 = vld [vmem:[#allocation8 + $0x60] ss:$16 sps:$4 sm:$0xff]  }
  0x44   :  { %526 = vmatpush1.bf16.msra.mxu0 %v915_v3  ;;  %v931_v17 = vld [vmem:[#allocation8 + $0x44] ss:$16 sps:$4 sm:$0xff]   ;;  %v942_v18 = vld [vmem:[#allocation8 + $0x88] ss:$16 sps:$4 sm:$0xff]   ;;  %v945_v19 = vld [vmem:[#allocation8 + $0x6c] ss:$16 sps:$4 sm:$0xff]  }
  0x45   :  { %527 = vmatprep.subr.bf16.mxu0 %v916_v4  ;;  %567 = vmatpush1.bf16.msra.mxu1 %v930_v10  ;;  %v935_v20 = vld [vmem:[#allocation8 + $0x40] ss:$16 sps:$4 sm:$0xff]   ;;  %v937_v21 = vld [vmem:[#allocation8 + $0x24] ss:$16 sps:$4 sm:$0xff]   ;;  %v948_v22 = vld [vmem:[#allocation8 + $0x68] ss:$16 sps:$4 sm:$0xff]  }
  0x46   :  { %568 = vmatprep.subr.bf16.mxu1 %v933_v13  ;;  %v951_v23 = vld [vmem:[#allocation8 + $0x4c] ss:$16 sps:$4 sm:$0xff]   ;;  %v941_v24 = vld [vmem:[#allocation8 + $0x20] ss:$16 sps:$4 sm:$0xff]   ;;  %v943_v25 = vld [vmem:[#allocation8 + $0x4] ss:$16 sps:$4 sm:$0xff]  }
  0x47   :  { %v954_v26 = vld [vmem:[#allocation8 + $0x48] ss:$16 sps:$4 sm:$0xff]   ;;  %v957_v27 = vld [vmem:[#allocation8 + $0x2c] ss:$16 sps:$4 sm:$0xff]   ;;  %v947_v28 = vld [vmem:[#allocation8] ss:$16 sps:$4 sm:$0xff]  }
  0x48   :  { %528 = vmatpush1.bf16.msra.mxu0 %v918_v7  ;;  %v949_v29 = vld [vmem:[#allocation8 + $0x1e4] ss:$16 sps:$4 sm:$0xff]   ;;  %v960_v30 = vld [vmem:[#allocation8 + $0x28] ss:$16 sps:$4 sm:$0xff]   ;;  %v963_v31 = vld [vmem:[#allocation8 + $0xc] ss:$16 sps:$4 sm:$0xff]  }
  0x49   :  { %529 = vmatprep.subr.bf16.mxu0 %v919_v8  ;;  %569 = vmatpush1.bf16.msra.mxu1 %v936_v14  ;;  %v1209_v33 = vmov 1966171168   ;;  %v953_v35 = vld [vmem:[#allocation8 + $0x1e0] ss:$16 sps:$4 sm:$0xff]   ;;  %v955_v36 = vld [vmem:[#allocation8 + $0x1c4] ss:$16 sps:$4 sm:$0xff]  }
  0x4a   :  { %570 = vmatprep.subr.bf16.mxu1 %v939_v15  ;;  %v188_v34 = vunpack.c.l.s4 %v1209_v33  ;;  %v966_v37 = vld [vmem:[#allocation8 + $0x8] ss:$16 sps:$4 sm:$0xff]   ;;  %v969_v38 = vld [vmem:[#allocation8 + $0x1ec] ss:$16 sps:$4 sm:$0xff]   ;;  %v1275_v39 = vshrl.u32 %v158_v32, 7  ;;  %v1009_v14 = vld [vmem:[#allocation10 + $0x20] sm:$0xff]  }
  0x4b   :  { %v959_v41 = vld [vmem:[#allocation8 + $0x1c0] ss:$16 sps:$4 sm:$0xff]   ;;  %v961_v42 = vld [vmem:[#allocation8 + $0x1a4] ss:$16 sps:$4 sm:$0xff]   ;;  %v972_v43 = vld [vmem:[#allocation8 + $0x1e8] ss:$16 sps:$4 sm:$0xff]  }
  0x4c   :  { %530 = vmatpush1.bf16.msra.mxu0 %v923_v11  ;;  %v189_v40 = vunpack.c.0.s8 %v188_v34  ;;  %v975_v44 = vld [vmem:[#allocation8 + $0x1cc] ss:$16 sps:$4 sm:$0xff]   ;;  %v965_v45 = vld [vmem:[#allocation8 + $0x1a0] ss:$16 sps:$4 sm:$0xff]   ;;  %v967_v48 = vld [vmem:[#allocation8 + $0x184] ss:$16 sps:$4 sm:$0xff]  }
  0x4d   :  { %531 = vmatprep.subr.bf16.mxu0 %v925_v12  ;;  %571 = vmatpush1.bf16.msra.mxu1 %v942_v18  ;;  %v789_v47 = vld.sshfl [vmem:[#allocation2] sm:$0x11 pattern:$0x75316420]  ;;  %v971_v51 = vld [vmem:[#allocation8 + $0x180] ss:$16 sps:$4 sm:$0xff]  }
  0x4e   :  { %572 = vmatprep.subr.bf16.mxu1 %v945_v19  ;;  %v192_v46 = vsub.s32 %v189_v40, %v1275_v39  ;;  %v978_v49 = vld [vmem:[#allocation8 + $0x1c8] ss:$16 sps:$4 sm:$0xff]   ;;  %v186_v50 = vcombine.high %v789_v47, %v789_v47  ;;  %v981_v52 = vld [vmem:[#allocation8 + $0x1ac] ss:$16 sps:$4 sm:$0xff]   ;;  %v973_v53 = vld [vmem:[#allocation8 + $0x164] ss:$16 sps:$4 sm:$0xff]  }
  0x4f   :  { %v984_v54 = vld [vmem:[#allocation8 + $0x1a8] ss:$16 sps:$4 sm:$0xff]   ;;  %v987_v56 = vld [vmem:[#allocation8 + $0x18c] ss:$16 sps:$4 sm:$0xff]   ;;  %v977_v57 = vld [vmem:[#allocation8 + $0x160] ss:$16 sps:$4 sm:$0xff]  }
  0x50   :  { %532 = vmatpush1.bf16.msra.mxu0 %v929_v16  ;;  %v200_v55 = vrot.slane %v186_v50, %v192_v46  ;;  %v979_v58 = vld [vmem:[#allocation8 + $0x144] ss:$16 sps:$4 sm:$0xff]   ;;  %v990_v59 = vld [vmem:[#allocation8 + $0x188] ss:$16 sps:$4 sm:$0xff]   ;;  %v993_v60 = vld [vmem:[#allocation8 + $0x16c] ss:$16 sps:$4 sm:$0xff]   ;;  %v193_v8 = vrot.slane %v789_v47, %v192_v46 }
  0x51   :  { %533 = vmatprep.subr.bf16.mxu0 %v931_v17  ;;  %573 = vmatpush1.bf16.msra.mxu1 %v948_v22  ;;  %v983_v61 = vld [vmem:[#allocation8 + $0x140] ss:$16 sps:$4 sm:$0xff]   ;;  %v985_v62 = vld [vmem:[#allocation8 + $0x124] ss:$16 sps:$4 sm:$0xff]   ;;  %v996_v63 = vld [vmem:[#allocation8 + $0x168] ss:$16 sps:$4 sm:$0xff]  }
  0x52   :  { %574 = vmatprep.subr.bf16.mxu1 %v951_v23  ;;  %555 = vmatprep.mubr.bf16.mxu0 %v200_v55  ;;  %v997_v0 = vld [vmem:[#allocation8 + $0x14c] ss:$16 sps:$4 sm:$0xff]   ;;  %v989_v1 = vld [vmem:[#allocation8 + $0x120] ss:$16 sps:$4 sm:$0xff]   ;;  %v991_v2 = vld [vmem:[#allocation8 + $0x104] ss:$16 sps:$4 sm:$0xff]  }
  0x53   :  { %596 = vmatprep.mubr.bf16.mxu1 %v200_v55  ;;  %v999_v3 = vld [vmem:[#allocation8 + $0x148] ss:$16 sps:$4 sm:$0xff]   ;;  %v1000_v4 = vld [vmem:[#allocation8 + $0x12c] ss:$16 sps:$4 sm:$0xff]   ;;  %v995_v5 = vld [vmem:[#allocation8 + $0x100] ss:$16 sps:$4 sm:$0xff]  }
  0x54   :  { %534 = vmatpush1.bf16.msra.mxu0 %v935_v20  ;;  %v1002_v6 = vld [vmem:[#allocation8 + $0x128] ss:$16 sps:$4 sm:$0xff]   ;;  %v1003_v7 = vld [vmem:[#allocation8 + $0x10c] ss:$16 sps:$4 sm:$0xff]   ;;  %v1210_v11 = vmov 0.0   ;;  %v1007_v12 = vld [vmem:[#allocation10 + $0x30] sm:$0xff]  }
  0x55   :  { %535 = vmatprep.subr.bf16.mxu0 %v937_v21  ;;  %575 = vmatpush1.bf16.msra.mxu1 %v954_v26  ;;  %v1005_v9 = vld [vmem:[#allocation8 + $0x108] ss:$16 sps:$4 sm:$0xff]   ;;  %vm1211_vm0 = vmmov 0   ;;  %v1011_v16 = vld [vmem:[#allocation10 + $0x10] sm:$0xff]   ;;  %v1013_v18 = vld [vmem:[#allocation10] sm:$0xff]   ;;  %v160_v19 = vsub.s32 0, %v1275_v39 }
  0x56   :  { %576 = vmatprep.subr.bf16.mxu1 %v957_v27  ;;  %v1006_v10 = vld [vmem:[#allocation10 + $0x38] sm:$0xff]   ;;  %v1008_v13 = vld [vmem:[#allocation10 + $0x28] sm:$0xff]   ;;  %v164_v21 = vsub.s32 1, %v1275_v39  ;;  %v168_v34 = vsub.s32 2, %v1275_v39  ;;  %s1212_s2 = smov [#allocation12]  }
  0x57   :  { %v1010_v15 = vld [vmem:[#allocation10 + $0x18] sm:$0xff]   ;;  %v1012_v17 = vld [vmem:[#allocation10 + $0x8] sm:$0xff]   ;;  %s761_s4 = sshll.u32 %s1212_s2, 4  ;;  %s762_s4 = int_to_ptr.vmem [resolvable:$true] %s761_s4 }
  0x58   :  { %536 = vmatpush1.bf16.msra.mxu0 %v941_v24  ;;  %v156_v20 = vld [vmem:[#allocation7] sm:$0xf]  ;;  %s1130_s9 = scalar_lea.vmem %s762_s4, 32  ;;  %p1135_p12 = scmp.lt.s32.totalorder %s762_s4, %s762_s4 }
  0x59   :  { %537 = vmatprep.subr.bf16.mxu0 %v943_v25  ;;  %577 = vmatpush1.bf16.msra.mxu1 %v960_v30  ;;  %v161_v22 = vrot.slane %v156_v20, %v160_v19  ;;  %v165_v23 = vrot.slane %v156_v20, %v164_v21  ;;  %v172_v30 = vsub.s32 3, %v1275_v39  ;;  %v605_v39 = vld [vmem:[#allocation5] sm:$0x3]  ;;  %p1131_p11 = scmp.ne.s32.totalorder %s762_s4, %s1130_s9  ;;  %p1136_p13 = scmp.lt.s32.totalorder %s1130_s9, %s1130_s9 }
  0x5a   :  { %578 = vmatprep.subr.bf16.mxu1 %v963_v31 }
  0x5b   :  { %p1137_p0 = por %p1136_p13, %p1135_p12 }
  0x5c   :  { %538 = vmatpush1.bf16.msra.mxu0 %v947_v28 }
  0x5d   :  { %539 = vmatprep.subr.bf16.mxu0 %v949_v29  ;;  %579 = vmatpush1.bf16.msra.mxu1 %v966_v37  ;;  %p1138_p1 = pnand %p1137_p0, %p1131_p11 }
  0x5e   :  { %580 = vmatprep.subr.bf16.mxu1 %v969_v38  ;;  %v169_v38 = vrot.slane %v156_v20, %v168_v34 }
  0x60   :  { %540 = vmatpush2.bf16.msra.mxu0 %v953_v35 }
  0x61   :  { %541 = vmatprep.subr.bf16.mxu0 %v955_v36  ;;  %581 = vmatpush2.bf16.msra.mxu1 %v972_v43  ;;  %v173_v36 = vrot.slane %v156_v20, %v172_v30 }
  0x62   :  { %582 = vmatprep.subr.bf16.mxu1 %v975_v44 }
  0x64   :  { %542 = vmatpush2.bf16.msra.mxu0 %v959_v41 }
  0x65   :  { %543 = vmatprep.subr.bf16.mxu0 %v961_v42  ;;  %583 = vmatpush2.bf16.msra.mxu1 %v978_v49 }
  0x66   :  { %584 = vmatprep.subr.bf16.mxu1 %v981_v52 }
  0x68   :  { %544 = vmatpush2.bf16.msra.mxu0 %v965_v45 }
  0x69   :  { %545 = vmatprep.subr.bf16.mxu0 %v967_v48  ;;  %585 = vmatpush2.bf16.msra.mxu1 %v984_v54 }
  0x6a   :  { %586 = vmatprep.subr.bf16.mxu1 %v987_v56 }
  0x6c   :  { %546 = vmatpush2.bf16.msra.mxu0 %v971_v51 }
  0x6d   :  { %547 = vmatprep.subr.bf16.mxu0 %v973_v53  ;;  %587 = vmatpush2.bf16.msra.mxu1 %v990_v59 }
  0x6e   :  { %588 = vmatprep.subr.bf16.mxu1 %v993_v60 }
  0x70   :  { %548 = vmatpush2.bf16.msra.mxu0 %v977_v57 }
  0x71   :  { %549 = vmatprep.subr.bf16.mxu0 %v979_v58  ;;  %589 = vmatpush2.bf16.msra.mxu1 %v996_v63 }
  0x72   :  { %590 = vmatprep.subr.bf16.mxu1 %v997_v0 }
  0x74   :  { %550 = vmatpush2.bf16.msra.mxu0 %v983_v61 }
  0x75   :  { %551 = vmatprep.subr.bf16.mxu0 %v985_v62  ;;  %591 = vmatpush2.bf16.msra.mxu1 %v999_v3 }
  0x76   :  { %592 = vmatprep.subr.bf16.mxu1 %v1000_v4 }
  0x78   :  { %552 = vmatpush2.bf16.msra.mxu0 %v989_v1 }
  0x79   :  { %553 = vmatprep.subr.bf16.mxu0 %v991_v2  ;;  %593 = vmatpush2.bf16.msra.mxu1 %v1002_v6 }
  0x7a   :  { %594 = vmatprep.subr.bf16.mxu1 %v1003_v7 }
  0x7c   :  { %554 = vmatpush2.bf16.msra.mxu0 %v995_v5 }
  0x7d   :  { %595 = vmatpush2.bf16.msra.mxu1 %v1005_v9  ;;  %875 = vmatprep.subr.bf16.mxu0 %v1210_v11 }
  0x7f   :  { %556 = vmatmul.mubr.bf16.vlgmr.msra.gmra.mxu0 %v193_v8 }
  0x80   :  { %597 = vmatmul.mubr.bf16.vlgmr.msra.gmra.mxu1 %v193_v8  ;;  %876 = vmatpush3.bf16.msra.mxu0 %v1006_v10 }
  0x81   :  { %877 = vmatprep.subr.bf16.mxu0 %v1210_v11  ;;  %891 = vmatprep.mubr.msk.bf16.mxu0 %vm1211_vm0, %v1210_v11 }
  0x84   :  { %878 = vmatpush3.bf16.msra.mxu0 %v1007_v12 }
  0x85   :  { %879 = vmatprep.subr.bf16.mxu0 %v1210_v11 }
  0x88   :  { %880 = vmatpush3.bf16.msra.mxu0 %v1008_v13 }
  0x89   :  { %881 = vmatprep.subr.bf16.mxu0 %v1210_v11 }
  0x8c   :  { %882 = vmatpush3.bf16.msra.mxu0 %v1009_v14 }
  0x8d   :  { %883 = vmatprep.subr.bf16.mxu0 %v1210_v11 }
  0x90   :  { %884 = vmatpush3.bf16.msra.mxu0 %v1010_v15 }
  0x91   :  { %885 = vmatprep.subr.bf16.mxu0 %v1210_v11 }
  0x94   :  { %886 = vmatpush3.bf16.msra.mxu0 %v1011_v16 }
  0x95   :  { %887 = vmatprep.subr.bf16.mxu0 %v1210_v11 }
  0x98   :  { %888 = vmatpush3.bf16.msra.mxu0 %v1012_v17 }
  0x99   :  { %889 = vmatprep.subr.bf16.mxu0 %v1210_v11 }
  0x9c   :  { %890 = vmatpush3.bf16.msra.mxu0 %v1013_v18 }
 0x13f   :  { %v557_v24 = vpop.f32.mrf.mxu0 }
 0x140   :  { %v558_v25 = vadd.f32 %v557_v24, %v161_v22  ;;  %v598_v32 = vpop.f32.mrf.mxu1 }
 0x141   :  { %v559_v26 = vpop.f32.mrf.mxu0  ;;  %v599_v42 = vadd.f32 %v598_v32, %v169_v38 }
 0x142   :  { %v854_v27 = vmul.f32 -1.442695, %v558_v25  ;;  %v560_v28 = vadd.f32 %v559_v26, %v165_v23  ;;  %v600_v35 = vpop.f32.mrf.mxu1 }
 0x143   :  { %v561_v29 = vpop.f32.mrf.mxu0  ;;  %v601_v41 = vadd.f32 %v600_v35, %v173_v36 }
 0x144   :  { %1014 = vpow2.f32 %v854_v27  ;;  %v855_v31 = vmul.f32 -1.442695, %v560_v28  ;;  %v602_v37 = vpop.f32.mrf.mxu1 }
 0x145   :  { %v562_v33 = vpop.f32.mrf.mxu0  ;;  %v856_v43 = vmul.f32 -1.442695, %v601_v41 }
 0x146   :  { %1016 = vpow2.f32 %v855_v31  ;;  %v603_v40 = vpop.f32.mrf.mxu1 }
 0x147   :  { %1018 = vtanh.f32 %v599_v42 }
 0x148   :  { %1020 = vpow2.f32 %v856_v43 }
 0x151   :  { %v1015_v44 = vpop.eup %1014 }
 0x152   :  { %v609_v45 = vadd.f32 1.0, %v1015_v44 }
 0x153   :  { %v1017_v46 = vpop.eup %1016 }
 0x154   :  { %1022 = vrcp.f32 %v609_v45  ;;  %v615_v47 = vadd.f32 1.0, %v1017_v46  ;;  %v1019_v48 = vpop.eup %1018 }
 0x155   :  { %v1021_v49 = vpop.eup %1020 }
 0x156   :  { %1024 = vrcp.f32 %v615_v47  ;;  %v622_v52 = vadd.f32 1.0, %v1021_v49 }
 0x158   :  { %1026 = vrcp.f32 %v622_v52 }
 0x161   :  { %v1023_v50 = vpop.eup %1022 }
 0x162   :  { %v626_v54 = vmul.f32 %v1023_v50, %v1019_v48 }
 0x163   :  { %v1025_v51 = vpop.eup %1024 }
 0x164   :  { %v625_v53 = vmul.f32 %v1025_v51, %v605_v39 }
 0x165   :  { %v1027_v56 = vpop.eup %1026 }
 0x166   :  { %v627_v55 = vadd.f32 %v626_v54, %v625_v53 }
 0x168   :  { %1028 = vtanh.f32 %v627_v55  ;;  %744 = vst [vmem:[#allocation14] sm:$0x3] %v627_v55 }
 0x175   :  { %v1029_v57 = vpop.eup %1028 }
 0x176   :  { %v629_v58 = vmul.f32 %v1029_v57, %v1027_v56 }
 0x178   :  { %v630_v59 = vpack.c.bf16 %v629_v58, %v629_v58  ;;  %743 = vst [vmem:[#allocation12] sm:$0x3] %v629_v58 }
 0x17a   :  { %892 = vmatmul.mubr.bf16.vlgmr.msra.gmra.mxu0 %v630_v59 }
 0x17b   :  { %1141 = shalt.err (!%p1138_p1)
}
 0x17c   :  { %764 = dma.vmem_to_hbm [thread:$0]  %s762_s4, 32, %s1301_s7, [#allocation13]  }
 0x17d   :  { %s1213_s12 = smov [#allocation14]  }
 0x17e   :  { %s771_s13 = sshll.u32 %s1213_s12, 4  ;;  %s772_s13 = int_to_ptr.vmem [resolvable:$true] %s771_s13 }
 0x17f   :  { %s1150_s14 = scalar_lea.vmem %s772_s13, 32  ;;  %p1155_p3 = scmp.lt.s32.totalorder %s772_s13, %s772_s13 }
 0x180   :  { %p1151_p2 = scmp.ne.s32.totalorder %s772_s13, %s1150_s14  ;;  %p1156_p4 = scmp.lt.s32.totalorder %s1150_s14, %s1150_s14 }
 0x182   :  { %p1157_p5 = por %p1156_p4, %p1155_p3 }
 0x184   :  { %p1158_p6 = pnand %p1157_p5, %p1151_p2 }
 0x186   :  { %1161 = shalt.err (!%p1158_p6)
}
 0x187   :  { %774 = dma.vmem_to_hbm [thread:$0]  %s772_s13, 32, %s1302_s8, [#allocation13]   ;;  %v857_v60 = vld [vmem:[%s1299_s5] ss:$0 sm:$0xff] }
 0x188   :  { %s1214_s19 = smov [#allocation11]  }
 0x189   :  { %s751_s7 = sshll.u32 %s1214_s19, 4  ;;  %s752_s7 = int_to_ptr.vmem [resolvable:$true] %s751_s7 }
 0x18a   :  { %s1170_s20 = scalar_lea.vmem %s752_s7, 32  ;;  %p1175_p8 = scmp.lt.s32.totalorder %s752_s7, %s752_s7 }
 0x18b   :  { %p1171_p7 = scmp.ne.s32.totalorder %s752_s7, %s1170_s20  ;;  %p1176_p9 = scmp.lt.s32.totalorder %s1170_s20, %s1170_s20 }
 0x18d   :  { %p1177_p10 = por %p1176_p9, %p1175_p8 }
 0x18f   :  { %p1178_p11 = pnand %p1177_p10, %p1171_p7 }
 0x23a   :  { %v736_v61 = vpop.f32.mrf.mxu0 }
 0x23b   :  { %v737_v62 = vadd.f32 %v857_v60, %v736_v61 }
 0x23c   :  { %v893_v63 = vpop.f32.mrf.mxu0 }
 0x23d   :  { %742 = vst [vmem:[#allocation11] sm:$0x3] %v737_v62 }
 0x23e   :  { %v739_v0 = vpop.f32.mrf.mxu0 }
 0x23f   :  { %1181 = shalt.err (!%p1178_p11)
}
 0x240   :  { %754 = dma.vmem_to_hbm [thread:$0]  %s752_s7, 32, %s1300_s6, [#allocation4]   ;;  %v894_v1 = vpop.f32.mrf.mxu0 }
 0x241   :  { %1196 = dma.done.wait [#allocation4], 32  }
 0x242   :  { %1197 = vsyncadd [#allocation4], 4294967264 }
 0x243   :  { %1198 = dma.done.wait [#allocation13], 64  }
 0x244   :  { %1199 = vsyncadd [#allocation13], 4294967232 }
 0x245   :  { %784 = vsyncpa [#allocation3], 1 }
 0x246   :  { %785 = vsyncpa [#allocation6], 1 }
 0x247   :  { %786 = vsyncpa [#allocation9], 1 }
 0x248   :  { %787 = vsyncpa [#allocation4], 1 }
 0x249   :  { %788 = vsyncpa [#allocation13], 1 }

</bundles_post_ra>
